<compile_context>
chip_gen: v6e
topology: v6e:2x2x1
jax: 0.10.0
libtpu: 0.0.40
codegen_flags: <defaults>
</compile_context>

<pallas_src>
import functools

import jax
import jax.numpy as jnp
from jax.experimental import pallas as pl
from jax.experimental.pallas import tpu as pltpu


def _round_up(n, m):
    return ((n + m - 1) // m) * m


def mlp_kernel(x_ref, w1_ref, b1_ref, w2_ref, b2_ref, o_ref, *, mxu_dtype=None):
    x = x_ref[...]
    w1 = w1_ref[...]
    w2 = w2_ref[...]
    if mxu_dtype is not None:
        # Optional bf16 MXU operands (f32 accumulation); ~1e-3 drift vs fp32.
        x, w1, w2 = x.astype(mxu_dtype), w1.astype(mxu_dtype), w2.astype(mxu_dtype)
    # Layer 1: x @ W1 + b1 -> tanh (tanh uses the EUP slot, co-issues with MXU).
    h = jnp.dot(x, w1, preferred_element_type=jnp.float32)
    h = jnp.tanh(h + b1_ref[...])          # b1 is (1, Hp), broadcasts over rows
    # Dropout: identity at inference time (PyTorch eval semantics).
    # TODO(synk): training-mode dropout (pltpu.prng_random_bits mask) not implemented.
    if mxu_dtype is not None:
        h = h.astype(mxu_dtype)
    # Layer 2: h @ W2 + b2
    out = jnp.dot(h, w2, preferred_element_type=jnp.float32) + b2_ref[...]
    o_ref[...] = out.astype(o_ref.dtype)


def prepare_params(w1, b1, w2, b2):
    """One-time parameter prep (hoisted out of the per-call path).

    Only the hidden dim is padded to a multiple of 128 so the intermediate
    activation h and w2's rows are lane-dense.  Padded hidden columns are
    exact zeros: tanh(0 + 0) = 0 and the corresponding zero rows of w2
    contribute nothing.  Feature (K) and category (N) dims are deliberately
    NOT padded: full-extent BlockSpec dims are exempt from the (8,128) rule,
    and padding them only inflates DMA traffic.
    """
    dim_fea, n_hiddens = w1.shape
    n_category = w2.shape[1]
    Hp = _round_up(n_hiddens, 128)
    ph = Hp - n_hiddens
    w1p = jnp.pad(w1, ((0, 0), (0, ph)))
    b1p = jnp.pad(b1, ((0, 0), (0, ph)))
    w2p = jnp.pad(w2, ((0, ph), (0, 0)))
    return w1p, b1p, w2p, b2


def mlp_classifier_forward(x, params, *, tile_m=1024, mxu_dtype=None,
                           vmem_soft_limit=12 * 1024 * 1024):
    """x: (B, dim_fea); params: output of prepare_params. Returns (B, n_category)."""
    w1p, b1p, w2p, b2 = params
    B, dim_fea = x.shape
    assert w1p.shape[0] == dim_fea
    Hp = w1p.shape[1]
    n_category = w2p.shape[1]

    kernel = functools.partial(mlp_kernel, mxu_dtype=mxu_dtype)

    itemsize = jnp.dtype(x.dtype).itemsize
    w_itemsize = jnp.dtype(w1p.dtype).itemsize
    weight_bytes = (w1p.size + b1p.size + w2p.size + b2.size) * w_itemsize

    def tile_bytes(t):
        # double-buffered streamed x and out tiles
        return 2 * (t * dim_fea + t * n_category) * itemsize

    # Batch tiling: pad B only to a sublane multiple of 8, never round it up
    # to a full tile; rebalance tm across tiles so overshoot stays < 8*n_tiles.
    Bp = _round_up(B, 8)
    n_tiles = pl.cdiv(Bp, tile_m)
    if n_tiles == 1 and Bp >= 1024:
        n_tiles = 2                       # keep both v7x TensorCores busy
    tm = _round_up(pl.cdiv(Bp, n_tiles), 8)

    # VMEM guard: resident weights (double-buffered by the pipeline) plus
    # streamed x/out tiles must fit the scoped VMEM budget on every generation
    # (v5e default 16 MiB scoped); shrink the batch tile first.
    while tm > 8 and 2 * weight_bytes + tile_bytes(tm) > vmem_soft_limit:
        n_tiles *= 2
        tm = _round_up(pl.cdiv(Bp, n_tiles), 8)
    n_tiles = pl.cdiv(Bp, tm)
    Bt = tm * n_tiles

    est = 2 * weight_bytes + tile_bytes(tm)
    if est > vmem_soft_limit:
        # Weights alone blow the budget: raise the scoped VMEM limit.
        # TODO(synk): for v7x (64 MiB physical) with very wide hidden dims,
        # tile Hp as a trailing "arbitrary" reduction axis with a VMEM
        # accumulator instead of keeping the weights fully resident.
        compiler_params = pltpu.CompilerParams(
            dimension_semantics=("parallel",),
            vmem_limit_bytes=min(int(est * 1.25), 100 * 1024 * 1024))
    else:
        compiler_params = pltpu.CompilerParams(
            dimension_semantics=("parallel",))

    if Bt != B:
        x = jnp.pad(x, ((0, Bt - B), (0, 0)))

    out_shape = jax.ShapeDtypeStruct((Bt, n_category), x.dtype)

    if n_tiles == 1:
        # Small problem: one grid-less invocation, no pipeline machinery,
        # everything resident in VMEM, nothing padded except the hidden dim.
        out = pl.pallas_call(kernel, out_shape=out_shape)(x, w1p, b1p, w2p, b2)
    else:
        out = pl.pallas_call(
            kernel,
            out_shape=out_shape,
            grid=(n_tiles,),
            in_specs=[
                # x streams per batch tile; feature dim kept at full extent
                # (exempt from the 128 rule) -> no K padding, 4x less x DMA.
                pl.BlockSpec((tm, dim_fea), lambda i: (i, 0)),
                # Weights/biases revisit block (0, 0): DMA'd once, VMEM-resident.
                pl.BlockSpec((dim_fea, Hp), lambda i: (0, 0)),
                pl.BlockSpec((1, Hp), lambda i: (0, 0)),
                pl.BlockSpec((Hp, n_category), lambda i: (0, 0)),
                pl.BlockSpec((1, n_category), lambda i: (0, 0)),
            ],
            # Output kept at the true n_category width: for tiny class counts a
            # masked store writes 16x fewer HBM bytes than padding to 128 and
            # removes the post-kernel column slice.
            out_specs=pl.BlockSpec((tm, n_category), lambda i: (i, 0)),
            compiler_params=compiler_params,
        )(x, w1p, b1p, w2p, b2)

    return out[:B] if Bt != B else out


def make_params(key, dim_fea, n_hiddens, n_category, dtype=jnp.float32):
    """Deterministic init mimicking nn.Linear's uniform(-1/sqrt(fan_in), 1/sqrt(fan_in))."""
    k1, k2, k3, k4 = jax.random.split(key, 4)
    bound1 = 1.0 / (dim_fea ** 0.5)
    bound2 = 1.0 / (n_hiddens ** 0.5)
    # Stored as (in, out) = transpose of PyTorch's (out, in) weight layout.
    w1 = jax.random.uniform(k1, (dim_fea, n_hiddens), dtype, -bound1, bound1)
    b1 = jax.random.uniform(k2, (1, n_hiddens), dtype, -bound1, bound1)
    w2 = jax.random.uniform(k3, (n_hiddens, n_category), dtype, -bound2, bound2)
    b2 = jax.random.uniform(k4, (1, n_category), dtype, -bound2, bound2)
    return w1, b1, w2, b2


if __name__ == "__main__":
    dim_fea, n_hiddens, n_category = 32, 64, 8

    key = jax.random.PRNGKey(0)
    kx, kp = jax.random.split(key)
    w1, b1, w2, b2 = make_params(kp, dim_fea, n_hiddens, n_category)
    params = prepare_params(w1, b1, w2, b2)   # padding done once, not per call

    # Reference in plain JAX (dropout is identity in eval mode).
    def ref_fn(xin):
        return jnp.tanh(xin @ w1 + b1) @ w2 + b2

    # 1) Small batch -> grid-less single invocation, fully unpadded K/N.
    x_small = jax.random.normal(kx, (8, dim_fea), jnp.float32)
    out = jax.block_until_ready(mlp_classifier_forward(x_small, params))
    assert out.shape == (8, n_category)
    assert jnp.allclose(out, ref_fn(x_small), atol=1e-4, rtol=1e-4)

    # 2) B=1024 -> forced split into 2 batch tiles (feeds both v7x TCs).
    x_mid = jax.random.normal(jax.random.PRNGKey(1), (1024, dim_fea), jnp.float32)
    out_mid = jax.block_until_ready(mlp_classifier_forward(x_mid, params))
    assert out_mid.shape == (1024, n_category)
    assert jnp.allclose(out_mid, ref_fn(x_mid), atol=1e-4, rtol=1e-4)

    # 3) Ragged batch (not a multiple of 8 or of the tile) -> multi-tile grid
    #    path with minimal row padding (rows padded only to 8 per-tile balance).
    x_big = jax.random.normal(jax.random.PRNGKey(2), (2052, dim_fea), jnp.float32)
    out_big = jax.block_until_ready(mlp_classifier_forward(x_big, params))
    assert out_big.shape == (2052, n_category)
    assert jnp.allclose(out_big, ref_fn(x_big), atol=1e-4, rtol=1e-4)

    # 4) Optional bf16 MXU-operand path (off by default; small drift vs fp32).
    out_bf16 = jax.block_until_ready(
        mlp_classifier_forward(x_small, params, mxu_dtype=jnp.bfloat16))
    assert out_bf16.shape == (8, n_category)
    assert bool(jnp.isfinite(out_bf16).all())
    assert float(jnp.max(jnp.abs(out_bf16 - ref_fn(x_small)))) < 0.25

    print("KERNEL_OK")
</pallas_src>

<mosaic_0001>
module attributes {stable_mosaic.version = 11 : i64} {
  func.func @mlp_kernel(%arg0: memref<8x32xf32, #tpu.memory_space<vmem>>, %arg1: memref<32x128xf32, #tpu.memory_space<vmem>>, %arg2: memref<1x128xf32, #tpu.memory_space<vmem>>, %arg3: memref<128x8xf32, #tpu.memory_space<vmem>>, %arg4: memref<1x8xf32, #tpu.memory_space<vmem>>, %arg5: memref<8x8xf32, #tpu.memory_space<vmem>>) attributes {dimension_semantics = [], scalar_prefetch = 0 : i64, scratch_operands = 0 : i64, tpu.core_type = #tpu.core_type<tc>} {
    %c0 = arith.constant 0 : index
    %c0_0 = arith.constant 0 : index
    %0 = vector.load %arg0[%c0, %c0_0] : memref<8x32xf32, #tpu.memory_space<vmem>>, vector<8x32xf32>
    %c0_1 = arith.constant 0 : index
    %c0_2 = arith.constant 0 : index
    %1 = vector.load %arg1[%c0_1, %c0_2] : memref<32x128xf32, #tpu.memory_space<vmem>>, vector<32x128xf32>
    %c0_3 = arith.constant 0 : index
    %c0_4 = arith.constant 0 : index
    %2 = vector.load %arg3[%c0_3, %c0_4] : memref<128x8xf32, #tpu.memory_space<vmem>>, vector<128x8xf32>
    %cst = arith.constant dense<0.000000e+00> : vector<8x128xf32>
    %3 = tpu.matmul %0, %1, %cst {dimension_numbers = #tpu.dot_dimension_numbers<[1], [0], [0], [1], [0, 0, 1, 1], [], []>} : vector<8x32xf32>, vector<32x128xf32>, vector<8x128xf32> -> vector<8x128xf32>
    %c0_5 = arith.constant 0 : index
    %c0_6 = arith.constant 0 : index
    %4 = vector.load %arg2[%c0_5, %c0_6] : memref<1x128xf32, #tpu.memory_space<vmem>>, vector<1x128xf32>
    %5 = vector.broadcast %4 : vector<1x128xf32> to vector<8x128xf32>
    %6 = arith.addf %3, %5 : vector<8x128xf32>
    %7 = math.tanh %6 : vector<8x128xf32>
    %cst_7 = arith.constant dense<0.000000e+00> : vector<8x8xf32>
    %8 = tpu.matmul %7, %2, %cst_7 {dimension_numbers = #tpu.dot_dimension_numbers<[1], [0], [0], [1], [0, 0, 1, 1], [], []>} : vector<8x128xf32>, vector<128x8xf32>, vector<8x8xf32> -> vector<8x8xf32>
    %c0_8 = arith.constant 0 : index
    %c0_9 = arith.constant 0 : index
    %9 = vector.load %arg4[%c0_8, %c0_9] : memref<1x8xf32, #tpu.memory_space<vmem>>, vector<1x8xf32>
    %10 = vector.broadcast %9 : vector<1x8xf32> to vector<8x8xf32>
    %11 = arith.addf %8, %10 : vector<8x8xf32>
    %c0_10 = arith.constant 0 : index
    %c0_11 = arith.constant 0 : index
    %12 = vector.load %arg5[%c0_10, %c0_11] : memref<8x8xf32, #tpu.memory_space<vmem>>, vector<8x8xf32>
    tpu.vector_store %arg5[%c0_10, %c0_11], %11 {strides = array<i32>} : memref<8x8xf32, #tpu.memory_space<vmem>>, vector<8x8xf32>,
    return
  }
}

</mosaic_0001>

<bundles_post_ra>
// kernel: tpu_custom_call.1
= control target key start
LH: loop header
LB: loop body
LE: loop exit
PB: predicated region body
PF: predicated region fallthrough
CT: control target
= control target key end

     0   :  { %v315_v1 = vmov 0.0   ;;  %vm316_vm0 = vmmov 0   ;;  %s444_s0 = inlined_call_operand.vmem [shape: f32[8,32], index: 0, kind: input, shape index: {}]   ;;  %s445_s1 = inlined_call_operand.vmem [shape: f32[32,128], index: 1, kind: input, shape index: {}]   ;;  %s446_s2 = inlined_call_operand.vmem [shape: f32[1,128], index: 2, kind: input, shape index: {}]   ;;  %s447_s3 = inlined_call_operand.vmem [shape: f32[128,8], index: 3, kind: input, shape index: {}]   ;;  %s448_s4 = inlined_call_operand.vmem [shape: f32[1,8], index: 4, kind: input, shape index: {}]   ;;  %s449_s5 = inlined_call_operand.hbm [shape: f32[8,8], index: 5, kind: output, shape index: {}]  }
   0x1   :  { %v25_v0 = vld [vmem:[%s445_s1 + $0x18] sm:$0xff]  ;;  %242 = vmatprep.subr.mxu0 %v315_v1  ;;  %v24_v2 = vld [vmem:[%s445_s1 + $0x10] sm:$0xff]  ;;  %250 = vmatprep.mubr.msk.f32.mxu0 %vm316_vm0, %v315_v1  ;;  %v23_v5 = vld [vmem:[%s445_s1 + $0x8] sm:$0xff] }
   0x2   :  { %v41_v3 = vld [vmem:[%s447_s3 + $0x78] sm:$0xff]  ;;  %243 = vmatpush3.msra.mxu0 %v25_v0  ;;  %253 = vmatprep.subr.mxu1 %v315_v1  ;;  %v40_v4 = vld [vmem:[%s447_s3 + $0x70] sm:$0xff]  ;;  %v39_v6 = vld [vmem:[%s447_s3 + $0x68] sm:$0xff] }
   0x3   :  { %244 = vmatprep.subr.mxu0 %v315_v1  ;;  %254 = vmatpush3.msra.mxu1 %v41_v3 }
   0x4   :  { %245 = vmatpush3.msra.mxu0 %v24_v2  ;;  %255 = vmatprep.subr.mxu1 %v315_v1 }
   0x5   :  { %10 = vsyncpa [#allocation3], 0  ;;  %246 = vmatprep.subr.mxu0 %v315_v1  ;;  %v22_v7 = vld [vmem:[%s445_s1] sm:$0xff]  ;;  %256 = vmatpush3.msra.mxu1 %v40_v4  ;;  %vm49_vm1 = vcmask 261120   ;;  %v37_v10 = vld [vmem:[%s447_s3 + $0x58] sm:$0xff]  ;;  %s317_s11 = smov [#allocation2]  }
   0x6   :  { %247 = vmatpush3.msra.mxu0 %v23_v5  ;;  %v21_v8 = vld [vmem:[%s444_s0] sm:$0xff]  ;;  %257 = vmatprep.subr.mxu1 %v315_v1  ;;  %v36_v11 = vld [vmem:[%s447_s3 + $0x50] sm:$0xff]  ;;  %v35_v12 = vld [vmem:[%s447_s3 + $0x48] sm:$0xff]  ;;  %vm201_vm2 = vcmask 64512  }
   0x7   :  { %v38_v9 = vld [vmem:[%s447_s3 + $0x60] sm:$0xff]  ;;  %248 = vmatprep.subr.mxu0 %v315_v1  ;;  %258 = vmatpush3.msra.mxu1 %v39_v6  ;;  %v33_v14 = vld [vmem:[%s447_s3 + $0x38] sm:$0xff]  ;;  %v32_v15 = vld [vmem:[%s447_s3 + $0x30] sm:$0xff] }
   0x8   :  { %249 = vmatpush3.msra.mxu0 %v22_v7  ;;  %259 = vmatprep.subr.mxu1 %v315_v1  ;;  %v34_v13 = vld [vmem:[%s447_s3 + $0x40] sm:$0xff]  ;;  %v31_v16 = vld [vmem:[%s447_s3 + $0x28] sm:$0xff]  ;;  %v29_v18 = vld [vmem:[%s447_s3 + $0x18] sm:$0xff] }
   0x9   :  { %251 = vmatmul.mubr.msk.f32.vlgmr.msra.gmra.mxu0 %vm49_vm1, %v21_v8  ;;  %260 = vmatpush3.msra.mxu1 %v38_v9  ;;  %v30_v17 = vld [vmem:[%s447_s3 + $0x20] sm:$0xff]  ;;  %v28_v19 = vld [vmem:[%s447_s3 + $0x10] sm:$0xff]  ;;  %v27_v20 = vld [vmem:[%s447_s3 + $0x8] sm:$0xff] }
   0xa   :  { %261 = vmatprep.subr.mxu1 %v315_v1  ;;  %285 = vmatprep.mubr.msk.f32.mxu1 %vm316_vm0, %v315_v1  ;;  %v26_v21 = vld [vmem:[%s447_s3] sm:$0xff]  ;;  %s209_s3 = sshll.u32 %s317_s11, 4  ;;  %s210_s3 = int_to_ptr.vmem [resolvable:$true] %s209_s3 }
   0xb   :  { %262 = vmatpush3.msra.mxu1 %v37_v10  ;;  %v217_v22 = vld [vmem:[%s446_s2] ss:$0 sm:$0xff]  ;;  %s293_s0 = scalar_lea.vmem %s210_s3, 128  ;;  %p298_p1 = scmp.lt.s32.totalorder %s210_s3, %s210_s3 }
   0xc   :  { %263 = vmatprep.subr.mxu1 %v315_v1  ;;  %v219_v27 = vld [vmem:[%s448_s4] ss:$0 sm:$0xff]  ;;  %p294_p0 = scmp.ne.s32.totalorder %s210_s3, %s293_s0  ;;  %p299_p2 = scmp.lt.s32.totalorder %s293_s0, %s293_s0 }
   0xd   :  { %264 = vmatpush3.msra.mxu1 %v36_v11 }
   0xe   :  { %265 = vmatprep.subr.mxu1 %v315_v1  ;;  %p300_p3 = por %p299_p2, %p298_p1 }
   0xf   :  { %266 = vmatpush3.msra.mxu1 %v35_v12 }
  0x10   :  { %267 = vmatprep.subr.mxu1 %v315_v1  ;;  %p301_p4 = pnand %p300_p3, %p294_p0 }
  0x11   :  { %268 = vmatpush3.msra.mxu1 %v34_v13 }
  0x12   :  { %269 = vmatprep.subr.mxu1 %v315_v1 }
  0x13   :  { %270 = vmatpush3.msra.mxu1 %v33_v14 }
  0x14   :  { %271 = vmatprep.subr.mxu1 %v315_v1 }
  0x15   :  { %272 = vmatpush3.msra.mxu1 %v32_v15 }
  0x16   :  { %273 = vmatprep.subr.mxu1 %v315_v1 }
  0x17   :  { %274 = vmatpush3.msra.mxu1 %v31_v16 }
  0x18   :  { %275 = vmatprep.subr.mxu1 %v315_v1 }
  0x19   :  { %276 = vmatpush3.msra.mxu1 %v30_v17 }
  0x1a   :  { %277 = vmatprep.subr.mxu1 %v315_v1 }
  0x1b   :  { %278 = vmatpush3.msra.mxu1 %v29_v18 }
  0x1c   :  { %279 = vmatprep.subr.mxu1 %v315_v1 }
  0x1d   :  { %280 = vmatpush3.msra.mxu1 %v28_v19 }
  0x1e   :  { %281 = vmatprep.subr.mxu1 %v315_v1 }
  0x1f   :  { %282 = vmatpush3.msra.mxu1 %v27_v20 }
  0x20   :  { %283 = vmatprep.subr.mxu1 %v315_v1 }
  0x21   :  { %284 = vmatpush3.msra.mxu1 %v26_v21 }
  0xc9   :  { %v119_v23 = vpop.f32.mrf.mxu0 }
  0xca   :  { %v120_v24 = vadd.f32 %v217_v22, %v119_v23 }
  0xcb   :  { %v252_v25 = vpop.f32.mrf.mxu0 }
  0xcc   :  { %291 = vtanh.f32 %v120_v24 }
  0xd9   :  { %v292_v26 = vpop.eup %291 }
  0xda   :  { %286 = vmatmul.mubr.f32.vlgmr.msra.gmra.mxu1 %v292_v26 }
 0x19a   :  { %v197_v28 = vpop.f32.mrf.mxu1 }
 0x19b   :  { %v198_v29 = vadd.f32 %v219_v27, %v197_v28 }
 0x19c   :  { %v287_v30 = vpop.f32.mrf.mxu1 }
 0x19d   :  { %202 = vst.msk [vmem:[#allocation2] sm:$0xff] %vm201_vm2, %v198_v29 }
 0x19e   :  { %304 = shalt.err (!%p301_p4)
}
 0x19f   :  { %212 = dma.vmem_to_hbm [thread:$0]  %s210_s3, 128, %s449_s5, [#allocation3]  }
 0x1a0   :  { %313 = dma.done.wait [#allocation3], 128  }
 0x1a1   :  { %314 = vsyncadd [#allocation3], 4294967168 }
 0x1a2   :  { %216 = vsyncpa [#allocation3], 1 }

</bundles_post_ra>
